<compile_context>
chip_gen: v7x
topology: tpu7x:2x2x1
jax: 0.10.0
libtpu: 0.0.40
codegen_flags: <defaults>
</compile_context>

<pallas_src>
import math

import jax
import jax.numpy as jnp
from jax import lax
from jax.experimental import pallas as pl
from jax.experimental.pallas import tpu as pltpu


def _round_up(x: int, m: int) -> int:
    return ((x + m - 1) // m) * m


def _vmem_budget() -> int:
    # v5e/v6e have 128 MiB physical VMEM -> 64 MiB budget; v7x has 64 -> 32 MiB.
    try:
        cap = pltpu.get_tpu_info().vmem_capacity_bytes
        return min(cap // 2, 64 * 1024 * 1024)
    except Exception:
        return 32 * 1024 * 1024


# ---------------------------------------------------------------------------
# Kernel 1: hw = h @ [W_mean | W_logstd]   (bf16 operands, f32 accumulate)
# ---------------------------------------------------------------------------
def _hw_kernel(h_ref, w_ref, hw_ref):
    hw = jnp.dot(h_ref[...], w_ref[...], preferred_element_type=jnp.float32)
    hw_ref[...] = hw.astype(jnp.bfloat16)


# ---------------------------------------------------------------------------
# Kernel 2: z = noise * exp(adj @ hw_logstd) + adj @ hw_mean
#           grid = (row_tiles, k_tiles), f32 accumulator over the K (node) axis
# ---------------------------------------------------------------------------
def _z_kernel(adj_ref, hw_ref, noise_ref, z_ref, acc_ref):
    k = pl.program_id(1)

    @pl.when(k == 0)
    def _():
        acc_ref[...] = jnp.zeros_like(acc_ref)

    # adj row/k tile (bf16, exact for {0,1}) @ hw k-tile (bf16) -> f32 MXU acc.
    acc_ref[...] += jnp.dot(adj_ref[...], hw_ref[...],
                            preferred_element_type=jnp.float32)

    @pl.when(k == pl.num_programs(1) - 1)
    def _():
        agg = acc_ref[...]
        d_pad = noise_ref.shape[-1]
        mean = agg[:, :d_pad]              # static, 128-aligned split
        log_std = agg[:, d_pad:]
        # Reparameterization kept in f32 (v5e has no bf16 VPU/EUP path).
        z = noise_ref[...] * jnp.exp(log_std) + mean
        z_ref[...] = z.astype(jnp.bfloat16)


# ---------------------------------------------------------------------------
# Kernel 3: a_pred = sigmoid(z z^T) -- 2-D output grid, bf16 writeback
# ---------------------------------------------------------------------------
def _decoder_kernel(zrow_ref, zcol_ref, out_ref):
    logits = lax.dot_general(
        zrow_ref[...], zcol_ref[...],
        dimension_numbers=(((1,), (1,)), ((), ())),   # contract last dims
        preferred_element_type=jnp.float32,
    )
    out_ref[...] = jax.nn.sigmoid(logits).astype(jnp.bfloat16)


# ---------------------------------------------------------------------------
# Wrapper reproducing Motify_Classifier.forward given precomputed h_motif.
# ---------------------------------------------------------------------------
def motify_classifier_forward(h_motif, edge_index, w_mean, w_logstd, noise,
                              *, row_tile=512, k_tile=512, dec_tile=512):
    n, d = h_motif.shape
    d_pad = _round_up(d, 128)

    # Clamp tiles for small graphs; pad N to a common multiple of all tiles.
    n_aligned = _round_up(n, 128)
    row_tile = min(row_tile, n_aligned)
    k_tile = min(k_tile, n_aligned)
    dec_tile = min(dec_tile, n_aligned)
    n_pad = _round_up(n, math.lcm(row_tile, k_tile, dec_tile))

    # Dense symmetric {0,1} adjacency, exactly as GraphConvSparse builds it
    # (both directions set to 1, duplicates collapse, no self-loops, no norm).
    adj = jnp.zeros((n, n), jnp.float32)
    adj = adj.at[edge_index[0], edge_index[1]].set(1.0)
    adj = adj.at[edge_index[1], edge_index[0]].set(1.0)

    # Pre-cast MXU operands to bf16 in the wrapper (halves DMA traffic; exact
    # for the {0,1} adjacency). noise stays f32 for the f32 reparam epilogue.
    h_p = (jnp.zeros((n_pad, d_pad), jnp.float32)
           .at[:n, :d].set(h_motif).astype(jnp.bfloat16))
    noise_p = jnp.zeros((n_pad, d_pad), jnp.float32).at[:n, :d].set(noise)
    adj_p = (jnp.zeros((n_pad, n_pad), jnp.float32)
             .at[:n, :n].set(adj).astype(jnp.bfloat16))

    # Stack both GraphConv weights -> one (D, 2D) GEMM shared by mean & logstd.
    w_stk = jnp.zeros((d_pad, 2 * d_pad), jnp.float32)
    w_stk = w_stk.at[:d, :d].set(w_mean)
    w_stk = w_stk.at[:d, d_pad:d_pad + d].set(w_logstd)
    w_stk = w_stk.astype(jnp.bfloat16)

    row_tiles = n_pad // row_tile
    k_tiles = n_pad // k_tile
    dec_tiles = n_pad // dec_tile
    vmem_cap = _vmem_budget()

    # --- Stage 1: hw = h @ [W_mean | W_logstd] ------------------------------
    hw = pl.pallas_call(
        _hw_kernel,
        out_shape=jax.ShapeDtypeStruct((n_pad, 2 * d_pad), jnp.bfloat16),
        grid=(row_tiles,),
        in_specs=[
            pl.BlockSpec((row_tile, d_pad), lambda i: (i, 0)),        # h row tile
            pl.BlockSpec((d_pad, 2 * d_pad), lambda i: (0, 0)),       # stacked W
        ],
        out_specs=pl.BlockSpec((row_tile, 2 * d_pad), lambda i: (i, 0)),
        compiler_params=pltpu.CompilerParams(
            dimension_semantics=("parallel",), vmem_limit_bytes=vmem_cap),
        cost_estimate=pl.CostEstimate(
            flops=2 * n_pad * d_pad * 2 * d_pad,
            transcendentals=0,
            # W is grid-invariant -> fetched once.
            bytes_accessed=(n_pad * d_pad * 2 + d_pad * 2 * d_pad * 2
                            + n_pad * 2 * d_pad * 2)),
    )(h_p, w_stk)

    # --- Stage 2: z = noise * exp(adj @ hw_ls) + adj @ hw_mean --------------
    # TODO(synk): for genuinely sparse graphs, scalar-prefetch a per-(row,k)
    # nonzero-block mask (PrefetchScalarGridSpec) and skip all-zero adj blocks.
    z = pl.pallas_call(
        _z_kernel,
        out_shape=jax.ShapeDtypeStruct((n_pad, d_pad), jnp.bfloat16),
        grid=(row_tiles, k_tiles),
        in_specs=[
            pl.BlockSpec((row_tile, k_tile), lambda i, k: (i, k)),    # adj tile
            pl.BlockSpec((k_tile, 2 * d_pad), lambda i, k: (k, 0)),   # hw k tile
            pl.BlockSpec((row_tile, d_pad), lambda i, k: (i, 0)),     # noise tile
        ],
        out_specs=pl.BlockSpec((row_tile, d_pad), lambda i, k: (i, 0)),
        scratch_shapes=[pltpu.VMEM((row_tile, 2 * d_pad), jnp.float32)],
        compiler_params=pltpu.CompilerParams(
            dimension_semantics=("parallel", "arbitrary"),
            vmem_limit_bytes=vmem_cap),
        cost_estimate=pl.CostEstimate(
            flops=2 * n_pad * n_pad * 2 * d_pad,
            transcendentals=n_pad * d_pad,
            # adj streamed once; hw re-streamed once per row tile.
            bytes_accessed=(n_pad * n_pad * 2
                            + row_tiles * n_pad * 2 * d_pad * 2
                            + n_pad * d_pad * 4 + n_pad * d_pad * 2)),
    )(adj_p, hw, noise_p)

    # --- Stage 3: a_pred = sigmoid(z z^T), 2-D lane-dense output grid -------
    # TODO(synk): if DMA is still exposed, add pipeline_mode=pl.Buffered(3) on
    # the z-column BlockSpec (the operand whose block changes every inner step).
    a_pred = pl.pallas_call(
        _decoder_kernel,
        out_shape=jax.ShapeDtypeStruct((n_pad, n_pad), jnp.bfloat16),
        grid=(dec_tiles, dec_tiles),
        in_specs=[
            pl.BlockSpec((dec_tile, d_pad), lambda i, j: (i, 0)),     # z row tile
            pl.BlockSpec((dec_tile, d_pad), lambda i, j: (j, 0)),     # z col tile
        ],
        out_specs=pl.BlockSpec((dec_tile, dec_tile), lambda i, j: (i, j)),
        compiler_params=pltpu.CompilerParams(
            dimension_semantics=("parallel", "parallel"),             # 2 TCs on v7x
            vmem_limit_bytes=vmem_cap),
        cost_estimate=pl.CostEstimate(
            flops=2 * n_pad * n_pad * d_pad,
            transcendentals=n_pad * n_pad,
            bytes_accessed=((dec_tiles + 1) * n_pad * d_pad * 2
                            + n_pad * n_pad * 2)),
    )(z, z)

    return a_pred[:n, :n].astype(jnp.float32)


def xavier_uniform(key, shape):
    fan_in, fan_out = shape
    r = jnp.sqrt(6.0 / (fan_in + fan_out))
    return jax.random.uniform(key, shape, jnp.float32, minval=-r, maxval=r)


def _reference_forward(h, edge_index, w_mean, w_logstd, noise):
    """Plain-JAX reference with the same bf16-operand / f32-accumulate policy."""
    n, d = h.shape
    bf = jnp.bfloat16
    adj = jnp.zeros((n, n), jnp.float32)
    adj = adj.at[edge_index[0], edge_index[1]].set(1.0)
    adj = adj.at[edge_index[1], edge_index[0]].set(1.0)
    w = jnp.concatenate([w_mean, w_logstd], axis=1)
    hw = jnp.dot(h.astype(bf), w.astype(bf),
                 preferred_element_type=jnp.float32).astype(bf)
    agg = jnp.dot(adj.astype(bf), hw, preferred_element_type=jnp.float32)
    mean, log_std = agg[:, :d], agg[:, d:]
    z = (noise * jnp.exp(log_std) + mean).astype(bf)
    logits = lax.dot_general(z, z, (((1,), (1,)), ((), ())),
                             preferred_element_type=jnp.float32)
    return jax.nn.sigmoid(logits)


if __name__ == "__main__":
    num_nodes = 8     # small node count
    emb_dim = 32      # small hidden dim (module default 300 -> would pad to 384)
    num_edges = 16

    key = jax.random.PRNGKey(0)
    k_h, k_wm, k_wl, k_e0, k_e1, k_noise = jax.random.split(key, 6)

    # TODO(synk): GNN_encoder (motif_encoder) is not defined in the reference
    # module; h_motif is taken here as a precomputed node-embedding input.
    h_motif = 0.2 * jax.random.normal(k_h, (num_nodes, emb_dim), jnp.float32)

    # GraphConvSparse weights (xavier_uniform_, deterministic)
    w_mean = xavier_uniform(k_wm, (emb_dim, emb_dim))
    w_logstd = xavier_uniform(k_wl, (emb_dim, emb_dim))

    # Deterministic edge_index (2, E)
    e0 = jax.random.randint(k_e0, (num_edges,), 0, num_nodes, dtype=jnp.int32)
    e1 = jax.random.randint(k_e1, (num_edges,), 0, num_nodes, dtype=jnp.int32)
    edge_index = jnp.stack([e0, e1], axis=0)

    # Deterministic stand-in for torch.randn(batched_data.x.size(0), emb_dim)
    noise = jax.random.normal(k_noise, (num_nodes, emb_dim), jnp.float32)

    a_pred = motify_classifier_forward(h_motif, edge_index, w_mean, w_logstd, noise)
    a_pred = jax.block_until_ready(a_pred)

    ref = _reference_forward(h_motif, edge_index, w_mean, w_logstd, noise)

    assert a_pred.shape == (num_nodes, num_nodes)
    assert bool(jnp.all(jnp.isfinite(a_pred)))
    assert bool(jnp.all((a_pred >= 0.0) & (a_pred <= 1.0)))
    assert bool(jnp.max(jnp.abs(a_pred - ref)) < 5e-2)
    print("KERNEL_OK")
</pallas_src>

<mosaic_0001>
module attributes {stable_mosaic.version = 11 : i64} {
  func.func @_hw_kernel(%arg0: i32, %arg1: memref<128x128xbf16, #tpu.memory_space<vmem>>, %arg2: memref<128x256xbf16, #tpu.memory_space<vmem>>, %arg3: memref<128x256xbf16, #tpu.memory_space<vmem>>) attributes {dimension_semantics = [#tpu.dimension_semantics<parallel>], iteration_bounds = array<i64: 1>, scalar_prefetch = 0 : i64, scratch_operands = 0 : i64, tpu.core_type = #tpu.core_type<tc>, window_params = [{transform_indices = @transform_0, window_bounds = array<i64: 128, 128>}, {pipeline_mode = #tpu.pipeline_mode<synchronous>, transform_indices = @transform_1, window_bounds = array<i64: 128, 256>}, {transform_indices = @transform_2, window_bounds = array<i64: 128, 256>}]} {
    %c0 = arith.constant 0 : index
    %c0_0 = arith.constant 0 : index
    %0 = vector.load %arg1[%c0, %c0_0] : memref<128x128xbf16, #tpu.memory_space<vmem>>, vector<128x128xbf16>
    %c0_1 = arith.constant 0 : index
    %c0_2 = arith.constant 0 : index
    %1 = vector.load %arg2[%c0_1, %c0_2] : memref<128x256xbf16, #tpu.memory_space<vmem>>, vector<128x256xbf16>
    %cst = arith.constant dense<0.000000e+00> : vector<128x256xf32>
    %2 = tpu.matmul %0, %1, %cst {dimension_numbers = #tpu.dot_dimension_numbers<[1], [0], [0], [1], [0, 0, 1, 1], [], []>} : vector<128x128xbf16>, vector<128x256xbf16>, vector<128x256xf32> -> vector<128x256xf32>
    %3 = arith.truncf %2 : vector<128x256xf32> to vector<128x256xbf16>
    %c0_3 = arith.constant 0 : index
    %c0_4 = arith.constant 0 : index
    %4 = vector.load %arg3[%c0_3, %c0_4] : memref<128x256xbf16, #tpu.memory_space<vmem>>, vector<128x256xbf16>
    tpu.vector_store %arg3[%c0_3, %c0_4], %3 {strides = array<i32>} : memref<128x256xbf16, #tpu.memory_space<vmem>>, vector<128x256xbf16>,
    return
  }
  func.func @transform_0(%arg0: i32) -> (i32, i32) {
    %c0_i32 = arith.constant 0 : i32
    %c0_i32_0 = arith.constant 0 : i32
    return %arg0, %c0_i32 : i32, i32
  }
  func.func @transform_1(%arg0: i32) -> (i32, i32) {
    %c0_i32 = arith.constant 0 : i32
    %c0_i32_0 = arith.constant 0 : i32
    %c0_i32_1 = arith.constant 0 : i32
    return %c0_i32, %c0_i32_0 : i32, i32
  }
  func.func @transform_2(%arg0: i32) -> (i32, i32) {
    %c0_i32 = arith.constant 0 : i32
    %c0_i32_0 = arith.constant 0 : i32
    return %arg0, %c0_i32 : i32, i32
  }
}

</mosaic_0001>

<bundles_post_ra>
// kernel: tpu_custom_call.1
= control target key start
LH: loop header
LB: loop body
LE: loop exit
PB: predicated region body
PF: predicated region fallthrough
CT: control target
= control target key end

     0   :  { %7 = vsyncpa [#allocation3], 0  ;;  %s701_s0 = inlined_call_operand.hbm [shape: bf16[128,128], index: 0, kind: input, shape index: {}]   ;;  %s702_s1 = inlined_call_operand.hbm [shape: bf16[128,256], index: 1, kind: input, shape index: {}]   ;;  %s703_s2 = inlined_call_operand.hbm [shape: bf16[128,256], index: 2, kind: output, shape index: {}]  }
   0x1   :  { %8 = vsyncpa [#allocation6], 0 }
   0x2   :  { %9 = vsyncpa [#allocation4], 0  ;;  %s628_s9 = smov [#allocation2]   ;;  %s556_s13 = scalar_lea.hbm %s701_s0, 1024 }
   0x3   :  { %s15_s10 = sshll.u32 %s628_s9, 4  ;;  %p557_p0 = scmp.ne.s32.totalorder %s701_s0, %s556_s13  ;;  %s16_s10 = int_to_ptr.vmem [resolvable:$true] %s15_s10 }
   0x4   :  { %p560_p1 = scmp.lt.u32.totalorder %s556_s13, %s701_s0 }
   0x6   :  { %p562_p2 = pnand %p560_p1, %p557_p0 }
   0x8   :  { %565 = shalt.err (!%p562_p2)
}
   0x9   :  { %s566_s18 = scalar_lea.vmem %s16_s10, 1024  ;;  %p571_p4 = scmp.lt.s32.totalorder %s16_s10, %s16_s10 }
   0xa   :  { %p567_p3 = scmp.ne.s32.totalorder %s16_s10, %s566_s18  ;;  %p572_p5 = scmp.lt.s32.totalorder %s566_s18, %s566_s18 }
   0xc   :  { %p573_p6 = por %p572_p5, %p571_p4 }
   0xe   :  { %p574_p7 = pnand %p573_p6, %p567_p3 }
  0x10   :  { %577 = shalt.err (!%p574_p7)
}
  0x11   :  { %s629_s19 = smov 64   ;;  %s630_s20 = smov 4  }
  0x12   :  { %21 = dma.hbm_to_vmem [thread:$0]  %s701_s0, 1024, %s16_s10, [#allocation3], %s629_s19, %s629_s19, %s630_s20  }
  0x13   :  { %s631_s23 = smov [#allocation5]   ;;  %s578_s27 = scalar_lea.hbm %s702_s1, 2048 }
  0x14   :  { %s27_s24 = sshll.u32 %s631_s23, 4  ;;  %p579_p8 = scmp.ne.s32.totalorder %s702_s1, %s578_s27  ;;  %s28_s24 = int_to_ptr.vmem [resolvable:$true] %s27_s24 }
  0x15   :  { %p582_p9 = scmp.lt.u32.totalorder %s578_s27, %s702_s1 }
  0x17   :  { %p584_p10 = pnand %p582_p9, %p579_p8 }
  0x19   :  { %587 = shalt.err (!%p584_p10)
}
  0x1a   :  { %s588_s4 = scalar_lea.vmem %s28_s24, 2048  ;;  %p593_p12 = scmp.lt.s32.totalorder %s28_s24, %s28_s24 }
  0x1b   :  { %p589_p11 = scmp.ne.s32.totalorder %s28_s24, %s588_s4  ;;  %p594_p13 = scmp.lt.s32.totalorder %s588_s4, %s588_s4 }
  0x1d   :  { %p595_p0 = por %p594_p13, %p593_p12 }
  0x1f   :  { %p596_p1 = pnand %p595_p0, %p589_p11 }
  0x21   :  { %599 = shalt.err (!%p596_p1)
}
  0x22   :  { %s632_s0 = smov 128   ;;  %s633_s5 = smov 8  }
  0x23   :  { %33 = dma.hbm_to_vmem [thread:$0]  %s702_s1, 2048, %s28_s24, [#allocation6], %s632_s0, %s632_s0, %s633_s5  }
  0x24   :  { %622 = dma.done.wait [#allocation3], 1024  }
  0x25   :  { %623 = vsyncadd [#allocation3], 4294966272 }
  0x26   :  { %624 = dma.done.wait [#allocation6], 2048  }
  0x27   :  { %625 = vsyncadd [#allocation6], 4294965248  ;;  %v634_v0 = vmov 0   ;;  %v524_v1 = vld [vmem:[#allocation5 + $0x4] ss:$8 sps:$4 sm:$0xff]   ;;  %v552_v21 = vld [vmem:[#allocation2 + $0x10] sm:$0xff]  }
  0x28   :  { %233 = vmatprep.mubr.bf16.mxu0 %v634_v0  ;;  %273 = vmatprep.mubr.bf16.mxu1 %v634_v0  ;;  %v526_v2 = vld [vmem:[#allocation5] ss:$8 sps:$4 sm:$0xff]   ;;  %v527_v3 = vld [vmem:[#allocation5 + $0x14] ss:$8 sps:$4 sm:$0xff]   ;;  %v529_v4 = vld [vmem:[#allocation5 + $0x10] ss:$8 sps:$4 sm:$0xff]  }
  0x29   :  { %201 = vmatprep.subr.bf16.mxu0 %v524_v1  ;;  %500 = vmatprep.subr.bf16.mxu1 %v524_v1  ;;  %v530_v5 = vld [vmem:[#allocation5 + $0x24] ss:$8 sps:$4 sm:$0xff]   ;;  %v532_v6 = vld [vmem:[#allocation5 + $0x20] ss:$8 sps:$4 sm:$0xff]   ;;  %v533_v7 = vld [vmem:[#allocation5 + $0x34] ss:$8 sps:$4 sm:$0xff]  }
  0x2a   :  { %202 = vmatpush1.bf16.msra.mxu0 %v526_v2  ;;  %508 = vmatpush1.bf16.msra.mxu1 %v526_v2  ;;  %v535_v8 = vld [vmem:[#allocation5 + $0x30] ss:$8 sps:$4 sm:$0xff]   ;;  %v536_v9 = vld [vmem:[#allocation5 + $0x44] ss:$8 sps:$4 sm:$0xff]   ;;  %v538_v10 = vld [vmem:[#allocation5 + $0x40] ss:$8 sps:$4 sm:$0xff]  }
  0x2b   :  { %203 = vmatprep.subr.bf16.mxu0 %v527_v3  ;;  %501 = vmatprep.subr.bf16.mxu1 %v527_v3  ;;  %v539_v11 = vld [vmem:[#allocation5 + $0x54] ss:$8 sps:$4 sm:$0xff]   ;;  %v541_v12 = vld [vmem:[#allocation5 + $0x50] ss:$8 sps:$4 sm:$0xff]   ;;  %v542_v13 = vld [vmem:[#allocation5 + $0x64] ss:$8 sps:$4 sm:$0xff]  }
  0x2c   :  { %v544_v14 = vld [vmem:[#allocation5 + $0x60] ss:$8 sps:$4 sm:$0xff]   ;;  %v545_v15 = vld [vmem:[#allocation5 + $0x74] ss:$8 sps:$4 sm:$0xff]   ;;  %v547_v16 = vld [vmem:[#allocation5 + $0x70] ss:$8 sps:$4 sm:$0xff]  }
  0x2d   :  { %v548_v17 = vld [vmem:[#allocation2] sm:$0xff]   ;;  %v550_v19 = vld [vmem:[#allocation2 + $0x8] sm:$0xff]   ;;  %v553_v22 = vld [vmem:[#allocation2 + $0x30] sm:$0xff]   ;;  %s635_s1 = smov [#allocation7]  }
  0x2e   :  { %204 = vmatpush1.bf16.msra.mxu0 %v529_v4  ;;  %509 = vmatpush1.bf16.msra.mxu1 %v529_v4  ;;  %v549_v18 = vld [vmem:[#allocation2 + $0x20] sm:$0xff]   ;;  %v551_v20 = vld [vmem:[#allocation2 + $0x28] sm:$0xff]   ;;  %v554_v23 = vld [vmem:[#allocation2 + $0x18] sm:$0xff]   ;;  %s431_s8 = sshll.u32 %s635_s1, 4  ;;  %s432_s8 = int_to_ptr.vmem [resolvable:$true] %s431_s8 }
  0x2f   :  { %205 = vmatprep.subr.bf16.mxu0 %v530_v5  ;;  %502 = vmatprep.subr.bf16.mxu1 %v530_v5  ;;  %v555_v24 = vld [vmem:[#allocation2 + $0x38] sm:$0xff]   ;;  %s600_s9 = scalar_lea.vmem %s432_s8, 2048  ;;  %p605_p3 = scmp.lt.s32.totalorder %s432_s8, %s432_s8 }
  0x30   :  { %p601_p2 = scmp.ne.s32.totalorder %s432_s8, %s600_s9  ;;  %p606_p4 = scmp.lt.s32.totalorder %s600_s9, %s600_s9 }
  0x32   :  { %206 = vmatpush1.bf16.msra.mxu0 %v532_v6  ;;  %510 = vmatpush1.bf16.msra.mxu1 %v532_v6  ;;  %p607_p5 = por %p606_p4, %p605_p3 }
  0x33   :  { %207 = vmatprep.subr.bf16.mxu0 %v533_v7  ;;  %503 = vmatprep.subr.bf16.mxu1 %v533_v7 }
  0x34   :  { %p608_p6 = pnand %p607_p5, %p601_p2 }
  0x36   :  { %208 = vmatpush1.bf16.msra.mxu0 %v535_v8  ;;  %511 = vmatpush1.bf16.msra.mxu1 %v535_v8 }
  0x37   :  { %209 = vmatprep.subr.bf16.mxu0 %v536_v9  ;;  %504 = vmatprep.subr.bf16.mxu1 %v536_v9 }
  0x3a   :  { %210 = vmatpush1.bf16.msra.mxu0 %v538_v10  ;;  %512 = vmatpush1.bf16.msra.mxu1 %v538_v10 }
  0x3b   :  { %211 = vmatprep.subr.bf16.mxu0 %v539_v11  ;;  %505 = vmatprep.subr.bf16.mxu1 %v539_v11 }
  0x3e   :  { %212 = vmatpush1.bf16.msra.mxu0 %v541_v12  ;;  %513 = vmatpush1.bf16.msra.mxu1 %v541_v12 }
  0x3f   :  { %213 = vmatprep.subr.bf16.mxu0 %v542_v13  ;;  %506 = vmatprep.subr.bf16.mxu1 %v542_v13 }
  0x42   :  { %214 = vmatpush1.bf16.msra.mxu0 %v544_v14  ;;  %514 = vmatpush1.bf16.msra.mxu1 %v544_v14 }
  0x43   :  { %215 = vmatprep.subr.bf16.mxu0 %v545_v15  ;;  %507 = vmatprep.subr.bf16.mxu1 %v545_v15 }
  0x46   :  { %216 = vmatpush1.bf16.msra.mxu0 %v547_v16  ;;  %515 = vmatpush1.bf16.msra.mxu1 %v547_v16 }
  0x49   :  { %234 = vmatmul.mubr.bf16.vlgmr.msra.gmra.mrb[0].mxu0 %v548_v17  ;;  %274 = vmatmul.mubr.bf16.vlgmr.msra.gmra.mrb[0].mxu1 %v549_v18 }
  0x4a   :  { %243 = vmatprep.mubr.bf16.mxu0 %v634_v0  ;;  %283 = vmatprep.mubr.bf16.mxu1 %v634_v0 }
  0x51   :  { %244 = vmatmul.mubr.bf16.gmra.mrb[4].mxu0 %v550_v19  ;;  %284 = vmatmul.mubr.bf16.gmra.mrb[4].mxu1 %v551_v20 }
  0x52   :  { %253 = vmatprep.mubr.bf16.mxu0 %v634_v0  ;;  %293 = vmatprep.mubr.bf16.mxu1 %v634_v0 }
  0x59   :  { %254 = vmatmul.mubr.bf16.gmra.mrb[8].mxu0 %v552_v21  ;;  %294 = vmatmul.mubr.bf16.gmra.mrb[8].mxu1 %v553_v22 }
  0x5a   :  { %263 = vmatprep.mubr.bf16.mxu0 %v634_v0  ;;  %303 = vmatprep.mubr.bf16.mxu1 %v634_v0 }
  0x61   :  { %264 = vmatmul.mubr.bf16.gmra.mrb[12].mxu0 %v554_v23  ;;  %304 = vmatmul.mubr.bf16.gmra.mrb[12].mxu1 %v555_v24 }
 0x11c   :  { %v235_v25 = vpop.f32.mrb[0].mxu0  ;;  %v275_v26 = vpop.f32.mrb[0].mxu1 }
 0x11d   :  { %v237_v27 = vpop.f32.mrb[1].mxu0  ;;  %v277_v28 = vpop.f32.mrb[1].mxu1 }
 0x11e   :  { %v484_v29 = vpack.c.bf16 %v237_v27, %v235_v25  ;;  %v492_v30 = vpack.c.bf16 %v277_v28, %v275_v26  ;;  %v239_v31 = vpop.f32.mrb[2].mxu0  ;;  %v279_v32 = vpop.f32.mrb[2].mxu1 }
 0x11f   :  { %v241_v33 = vpop.f32.mrb[3].mxu0  ;;  %v281_v34 = vpop.f32.mrb[3].mxu1 }
 0x120   :  { %410 = vst [vmem:[#allocation7] sm:$0xff] %v484_v29  ;;  %418 = vst [vmem:[#allocation7 + $0x40] sm:$0xff] %v492_v30  ;;  %v485_v35 = vpack.c.bf16 %v241_v33, %v239_v31  ;;  %v493_v36 = vpack.c.bf16 %v281_v34, %v279_v32 }
 0x122   :  { %411 = vst [vmem:[#allocation7 + $0x8] sm:$0xff] %v485_v35  ;;  %419 = vst [vmem:[#allocation7 + $0x48] sm:$0xff] %v493_v36 }
 0x124   :  { %v245_v37 = vpop.f32.mrb[4].mxu0  ;;  %v285_v38 = vpop.f32.mrb[4].mxu1 }
 0x125   :  { %v247_v39 = vpop.f32.mrb[5].mxu0  ;;  %v287_v40 = vpop.f32.mrb[5].mxu1 }
 0x126   :  { %v486_v41 = vpack.c.bf16 %v247_v39, %v245_v37  ;;  %v494_v42 = vpack.c.bf16 %v287_v40, %v285_v38  ;;  %v249_v43 = vpop.f32.mrb[6].mxu0  ;;  %v289_v44 = vpop.f32.mrb[6].mxu1 }
 0x127   :  { %v251_v45 = vpop.f32.mrb[7].mxu0  ;;  %v291_v46 = vpop.f32.mrb[7].mxu1 }
 0x128   :  { %412 = vst [vmem:[#allocation7 + $0x10] sm:$0xff] %v486_v41  ;;  %420 = vst [vmem:[#allocation7 + $0x50] sm:$0xff] %v494_v42  ;;  %v487_v47 = vpack.c.bf16 %v251_v45, %v249_v43  ;;  %v495_v48 = vpack.c.bf16 %v291_v46, %v289_v44 }
 0x12a   :  { %413 = vst [vmem:[#allocation7 + $0x18] sm:$0xff] %v487_v47  ;;  %421 = vst [vmem:[#allocation7 + $0x58] sm:$0xff] %v495_v48 }
 0x12c   :  { %v255_v49 = vpop.f32.mrb[8].mxu0  ;;  %v295_v50 = vpop.f32.mrb[8].mxu1 }
 0x12d   :  { %v257_v51 = vpop.f32.mrb[9].mxu0  ;;  %v297_v52 = vpop.f32.mrb[9].mxu1 }
 0x12e   :  { %v488_v53 = vpack.c.bf16 %v257_v51, %v255_v49  ;;  %v496_v54 = vpack.c.bf16 %v297_v52, %v295_v50  ;;  %v259_v55 = vpop.f32.mrb[10].mxu0  ;;  %v299_v56 = vpop.f32.mrb[10].mxu1 }
 0x12f   :  { %v261_v57 = vpop.f32.mrb[11].mxu0  ;;  %v301_v58 = vpop.f32.mrb[11].mxu1 }
 0x130   :  { %414 = vst [vmem:[#allocation7 + $0x20] sm:$0xff] %v488_v53  ;;  %422 = vst [vmem:[#allocation7 + $0x60] sm:$0xff] %v496_v54  ;;  %v489_v59 = vpack.c.bf16 %v261_v57, %v259_v55  ;;  %v497_v60 = vpack.c.bf16 %v301_v58, %v299_v56 }
 0x132   :  { %415 = vst [vmem:[#allocation7 + $0x28] sm:$0xff] %v489_v59  ;;  %423 = vst [vmem:[#allocation7 + $0x68] sm:$0xff] %v497_v60 }
 0x134   :  { %v265_v61 = vpop.f32.mrb[12].mxu0  ;;  %v305_v62 = vpop.f32.mrb[12].mxu1 }
 0x135   :  { %v267_v63 = vpop.f32.mrb[13].mxu0  ;;  %v307_v0 = vpop.f32.mrb[13].mxu1 }
 0x136   :  { %v490_v1 = vpack.c.bf16 %v267_v63, %v265_v61  ;;  %v498_v2 = vpack.c.bf16 %v307_v0, %v305_v62  ;;  %v269_v3 = vpop.f32.mrb[14].mxu0  ;;  %v309_v4 = vpop.f32.mrb[14].mxu1 }
 0x137   :  { %v271_v5 = vpop.f32.mrb[15].mxu0  ;;  %v311_v6 = vpop.f32.mrb[15].mxu1 }
 0x138   :  { %416 = vst [vmem:[#allocation7 + $0x30] sm:$0xff] %v490_v1  ;;  %424 = vst [vmem:[#allocation7 + $0x70] sm:$0xff] %v498_v2  ;;  %v491_v7 = vpack.c.bf16 %v271_v5, %v269_v3  ;;  %v499_v8 = vpack.c.bf16 %v311_v6, %v309_v4 }
 0x13a   :  { %417 = vst [vmem:[#allocation7 + $0x38] sm:$0xff] %v491_v7  ;;  %425 = vst [vmem:[#allocation7 + $0x78] sm:$0xff] %v499_v8 }
 0x13b   :  { %611 = shalt.err (!%p608_p6)
}
 0x13c   :  { %s612_s12 = scalar_lea.hbm %s703_s2, 2048 }
 0x13d   :  { %p613_p7 = scmp.ne.s32.totalorder %s703_s2, %s612_s12  ;;  %p616_p8 = scmp.lt.u32.totalorder %s612_s12, %s703_s2 }
 0x13f   :  { %p618_p9 = pnand %p616_p8, %p613_p7 }
 0x141   :  { %621 = shalt.err (!%p618_p9)
}
 0x142   :  { %437 = dma.vmem_to_hbm [thread:$0]  %s432_s8, 2048, %s703_s2, [#allocation4], %s632_s0, %s632_s0, %s633_s5  }
 0x143   :  { %626 = dma.done.wait [#allocation4], 2048  }
 0x144   :  { %627 = vsyncadd [#allocation4], 4294965248 }
 0x145   :  { %441 = vsyncpa [#allocation3], 1 }
 0x146   :  { %442 = vsyncpa [#allocation6], 1 }
 0x147   :  { %443 = vsyncpa [#allocation4], 1 }

</bundles_post_ra>
